<compile_context>
chip_gen: v7x
topology: tpu7x:2x2x1
jax: 0.10.0
libtpu: 0.0.40
codegen_flags: <defaults>
</compile_context>

<pallas_src>
import functools

import jax
import jax.numpy as jnp
from jax import lax
from jax.experimental import pallas as pl
from jax.experimental.pallas import tpu as pltpu


def _encoder_output_state_kernel(x_ref, w_ref, b_ref, o_ref, acc_ref, *,
                                 aggregation, scale, seq_len, seq_tile, ragged):
    """Streaming seq-aggregation + linear projection.

    x_ref:   (B_tile, TS, Din)   enc_output tile (native dtype)
    w_ref:   (Din, Dout)         nn.Linear weight, pre-transposed, resident
    b_ref:   (1, Dout)           bias, resident
    o_ref:   (B_tile, Dout)      output tile (written on last reduction step)
    acc_ref: (B_tile, Din) f32   running aggregation accumulator (VMEM scratch)
    """
    k = pl.program_id(1)
    last_k = pl.num_programs(1) - 1

    x = x_ref[...]  # keep the hot tile in its native dtype (no upfront f32 copy)

    if ragged:
        # cdiv seq grid: the last tile may hang past seq_len. Mask padded rows
        # before reducing (0 for sum/mean, -inf/+inf for max/min). This is pure
        # VPU work and free under the HBM roofline.
        pos = k * seq_tile + lax.broadcasted_iota(jnp.int32, x.shape, 1)
        if aggregation in ("mean", "sum"):
            fill = jnp.zeros((), dtype=x.dtype)
        elif aggregation == "max":
            fill = jnp.array(-jnp.inf, dtype=x.dtype)
        else:
            fill = jnp.array(jnp.inf, dtype=x.dtype)
        x = jnp.where(pos < seq_len, x, fill)

    if aggregation in ("mean", "sum"):
        # f32 accumulation of the partial sum without materializing an f32
        # copy of the whole (B_tile, TS, Din) tile.
        part = jnp.sum(x, axis=1, dtype=jnp.float32)         # (B_tile, Din)

        @pl.when(k == 0)
        def _():
            acc_ref[...] = jnp.zeros_like(acc_ref)

        acc_ref[...] = acc_ref[...] + part

    elif aggregation == "max":
        part = jnp.max(x, axis=1).astype(jnp.float32)        # reduce native, cast small result

        @pl.when(k == 0)
        def _():
            acc_ref[...] = jnp.full_like(acc_ref, -jnp.inf)

        acc_ref[...] = jnp.maximum(acc_ref[...], part)

    elif aggregation == "min":
        part = jnp.min(x, axis=1).astype(jnp.float32)

        @pl.when(k == 0)
        def _():
            acc_ref[...] = jnp.full_like(acc_ref, jnp.inf)

        acc_ref[...] = jnp.minimum(acc_ref[...], part)

    else:
        raise ValueError(f"Aggregation '{aggregation}' not supported")

    # Epilogue: scale (mean), project, bias — only once per batch block.
    @pl.when(k == last_k)
    def _():
        agg = acc_ref[...]                                   # (B_tile, Din) f32
        if aggregation == "mean":
            agg = agg * scale                                # 1/S (true length) on the small result only
        # (B_tile, Din) @ (Din, Dout): MXU-native, no in-kernel weight transpose.
        out = jnp.dot(agg, w_ref[...], preferred_element_type=jnp.float32)
        out = out + b_ref[...]                               # (1, Dout) broadcast
        o_ref[...] = out.astype(o_ref.dtype)


def _scoped_vmem_limit():
    """Generation-aware scoped-VMEM limit (v5e/v6e: 128 MiB phys, v7x: 64 MiB)."""
    phys = 64 << 20  # conservative default (v7x-sized) if the query is unavailable
    try:
        info = pltpu.get_tpu_info()
        phys = int(getattr(info, "vmem_capacity_bytes", phys))
    except Exception:
        pass
    return max(16 << 20, min((phys * 3) // 4, 96 << 20))


def _pick_batch_tile(B):
    candidates = (512, 256, 128, 64, 32, 16, 8)
    # Prefer >=2 batch blocks so dimension_semantics=("parallel", ...) can shard
    # the batch axis across v7x's two TensorCores (no-op on single-TC v5e/v6e).
    for bt in candidates:
        if B % bt == 0 and B // bt >= 2:
            return bt
    for bt in candidates:
        if B % bt == 0:
            return bt
    return B


def _pick_seq_tile(S, b_tile, d_in, d_out, x_itemsize, w_itemsize, out_itemsize,
                   vmem_limit, resident_copies):
    """Largest seq tile whose double-buffered input fits what is left of VMEM."""
    # dtype-aware sublane granularity: f32 -> 8, bf16 -> 16, int8/fp8 -> 32.
    gran = {4: 8, 2: 16, 1: 32}.get(x_itemsize, 8)
    if S <= gran:
        return S, False
    # Account for everything else living in VMEM alongside the input pipeline.
    resident = resident_copies * (d_in * d_out + d_out) * w_itemsize   # weight + bias buffers
    resident += b_tile * d_in * 4                                      # f32 accumulator scratch
    resident += 2 * b_tile * d_out * out_itemsize                      # double-buffered output
    margin = 2 << 20                                                   # compiler-internal scratch
    avail = vmem_limit - resident - margin
    per_buf = max(avail // 2, 0)            # input is double-buffered
    per_buf = min(per_buf, 12 << 20)        # >12 MiB tiles buy <1% (HBM-roofline-bound)
    max_ts = per_buf // max(1, b_tile * d_in * x_itemsize)
    max_ts = (max_ts // gran) * gran
    if max_ts < gran:
        max_ts = gran                       # degenerate case (huge resident weight)
    if S <= max_ts:
        return S, False
    return max_ts, (S % max_ts) != 0


def _build_call(B, S, Din, Dout, x_dtype, aggregation, b_tile, ts, ragged,
                vmem_limit, single_buffer_resident):
    kernel = functools.partial(
        _encoder_output_state_kernel,
        aggregation=aggregation,
        scale=1.0 / float(S),
        seq_len=S,
        seq_tile=ts,
        ragged=ragged,
    )
    # Resident operands never re-DMA (constant index_map); a single buffer
    # reclaims one full weight copy of VMEM headroom.
    resident_kwargs = (
        {"pipeline_mode": pl.Buffered(1)} if single_buffer_resident else {}
    )
    return pl.pallas_call(
        kernel,
        out_shape=jax.ShapeDtypeStruct((B, Dout), x_dtype),
        grid_spec=pltpu.PrefetchScalarGridSpec(
            num_scalar_prefetch=0,
            grid=(B // b_tile, pl.cdiv(S, ts)),              # reduction (seq) axis last
            in_specs=[
                pl.BlockSpec((b_tile, ts, Din), lambda i, k: (i, k, 0)),
                pl.BlockSpec((Din, Dout), lambda i, k: (0, 0), **resident_kwargs),
                pl.BlockSpec((1, Dout), lambda i, k: (0, 0), **resident_kwargs),
            ],
            out_specs=pl.BlockSpec((b_tile, Dout), lambda i, k: (i, 0)),
            scratch_shapes=[pltpu.VMEM((b_tile, Din), jnp.float32)],
        ),
        compiler_params=pltpu.CompilerParams(
            dimension_semantics=("parallel", "arbitrary"),
            vmem_limit_bytes=vmem_limit,
        ),
    )


def encoder_output_state(enc_output, weight, bias, num_layers, aggregation="mean",
                         _seq_tile=None):
    """JAX/Pallas equivalent of EncoderOutputState.forward.

    enc_output: (B, S, Din)
    weight:     (Dout, Din)   (PyTorch nn.Linear layout)
    bias:       (Dout,)
    returns:    (num_layers, B, Dout)
    """
    if aggregation not in ("mean", "sum", "max", "min"):
        raise ValueError("Supported aggregations are 'mean', 'sum', 'max' or 'min'")

    B, S, Din = enc_output.shape
    Dout = weight.shape[0]

    w_t = jnp.transpose(weight)        # (Din, Dout): one-time wrapper-side transpose
    b2d = bias.reshape(1, Dout)        # keep >=2D for TPU layout friendliness

    vmem_limit = _scoped_vmem_limit()
    b_tile = _pick_batch_tile(B)

    def plan(resident_copies):
        if _seq_tile is not None:      # test hook: force a given seq tile
            return _seq_tile, (S % _seq_tile) != 0
        return _pick_seq_tile(
            S, b_tile, Din, Dout,
            enc_output.dtype.itemsize, w_t.dtype.itemsize,
            enc_output.dtype.itemsize, vmem_limit, resident_copies)

    args = (enc_output, w_t, b2d)
    try:
        ts, ragged = plan(resident_copies=1)
        call = _build_call(B, S, Din, Dout, enc_output.dtype, aggregation,
                           b_tile, ts, ragged, vmem_limit,
                           single_buffer_resident=True)
        out = jax.block_until_ready(call(*args))
    except Exception:
        # pl.Buffered(1) on resident operands may be unsupported on some jax
        # versions; fall back to default double-buffering (and budget for it).
        ts, ragged = plan(resident_copies=2)
        call = _build_call(B, S, Din, Dout, enc_output.dtype, aggregation,
                           b_tile, ts, ragged, vmem_limit,
                           single_buffer_resident=False)
        out = jax.block_until_ready(call(*args))

    # out.repeat(num_layers, 1, 1): (B, Dout) -> (num_layers, B, Dout)
    return jnp.broadcast_to(out[None, :, :], (num_layers, B, Dout))


def _reference(enc_output, weight, bias, num_layers, aggregation):
    if aggregation == "mean":
        agg = enc_output.mean(axis=-2)
    elif aggregation == "sum":
        agg = enc_output.sum(axis=-2)
    elif aggregation == "max":
        agg = enc_output.max(axis=-2)
    else:
        agg = enc_output.min(axis=-2)
    out = agg @ weight.T + bias
    return jnp.broadcast_to(out[None], (num_layers,) + out.shape)


if __name__ == "__main__":
    key = jax.random.PRNGKey(0)
    k_x, k_w, k_b, k_x2 = jax.random.split(key, 4)

    ok = True

    # Case 1: small shapes implied by the forward: enc_output (batch, seq, input_size)
    batch, seq, input_size, output_size, num_layers = 2, 8, 32, 32, 3
    enc_output = jax.random.normal(k_x, (batch, seq, input_size), dtype=jnp.float32)
    # Deterministic synthetic Linear params (nn.Linear shape: (out, in) and (out,))
    weight = jax.random.normal(k_w, (output_size, input_size), dtype=jnp.float32) * 0.1
    bias = jax.random.normal(k_b, (output_size,), dtype=jnp.float32) * 0.1

    for agg in ("mean", "sum", "max", "min"):
        got = encoder_output_state(enc_output, weight, bias, num_layers, agg)
        got = jax.block_until_ready(got)
        want = _reference(enc_output, weight, bias, num_layers, agg)
        if got.shape != (num_layers, batch, output_size):
            ok = False
        if not jnp.allclose(got, want, atol=1e-4, rtol=1e-4):
            ok = False

    # Case 2: ragged seq (not a multiple of the forced tile) exercises the
    # cdiv grid + in-kernel masking path.
    seq2 = 20
    enc_output2 = jax.random.normal(k_x2, (batch, seq2, input_size), dtype=jnp.float32)
    for agg in ("mean", "sum", "max", "min"):
        got = encoder_output_state(enc_output2, weight, bias, num_layers, agg,
                                   _seq_tile=8)
        got = jax.block_until_ready(got)
        want = _reference(enc_output2, weight, bias, num_layers, agg)
        if got.shape != (num_layers, batch, output_size):
            ok = False
        if not jnp.allclose(got, want, atol=1e-4, rtol=1e-4):
            ok = False

    if ok:
        print("KERNEL_OK")
</pallas_src>

<mosaic_0001>
module attributes {stable_mosaic.version = 11 : i64} {
  func.func @_encoder_output_state_kernel(%arg0: i32, %arg1: i32, %arg2: memref<2x8x32xf32, #tpu.memory_space<vmem>>, %arg3: memref<32x32xf32, #tpu.memory_space<vmem>>, %arg4: memref<1x32xf32, #tpu.memory_space<vmem>>, %arg5: memref<2x32xf32, #tpu.memory_space<vmem>>, %arg6: memref<2x32xf32, #tpu.memory_space<vmem>>) attributes {dimension_semantics = [#tpu.dimension_semantics<parallel>, #tpu.dimension_semantics<arbitrary>], iteration_bounds = array<i64: 1, 1>, scalar_prefetch = 0 : i64, scratch_operands = 1 : i64, tpu.core_type = #tpu.core_type<tc>, window_params = [{transform_indices = @transform_0, window_bounds = array<i64: 2, 8, 32>}, {pipeline_mode = #tpu.pipeline_mode<synchronous>, transform_indices = @transform_1, window_bounds = array<i64: 32, 32>}, {pipeline_mode = #tpu.pipeline_mode<synchronous>, transform_indices = @transform_2, window_bounds = array<i64: 1, 32>}, {transform_indices = @transform_3, window_bounds = array<i64: 2, 32>}]} {
    %c0 = arith.constant 0 : index
    %c0_0 = arith.constant 0 : index
    %c0_1 = arith.constant 0 : index
    %0 = vector.load %arg2[%c0, %c0_0, %c0_1] : memref<2x8x32xf32, #tpu.memory_space<vmem>>, vector<2x8x32xf32>
    %cst = arith.constant dense<0.000000e+00> : vector<2x32xf32>
    %1 = vector.multi_reduction <add>, %0, %cst [1] : vector<2x8x32xf32> to vector<2x32xf32>
    %c0_i32 = arith.constant 0 : i32
    %2 = arith.cmpi eq, %arg1, %c0_i32 : i32
    %3 = arith.extui %2 : i1 to i32
    %c0_i32_2 = arith.constant 0 : i32
    %4 = arith.cmpi ne, %3, %c0_i32_2 : i32
    scf.if %4 {
      %cst_9 = arith.constant 0.000000e+00 : f32
      %11 = vector.broadcast %cst_9 : f32 to vector<2x32xf32>
      %c0_10 = arith.constant 0 : index
      %c0_11 = arith.constant 0 : index
      %12 = vector.load %arg6[%c0_10, %c0_11] : memref<2x32xf32, #tpu.memory_space<vmem>>, vector<2x32xf32>
      tpu.vector_store %arg6[%c0_10, %c0_11], %11 {strides = array<i32>} : memref<2x32xf32, #tpu.memory_space<vmem>>, vector<2x32xf32>,
    } else {
    }
    %c0_3 = arith.constant 0 : index
    %c0_4 = arith.constant 0 : index
    %5 = vector.load %arg6[%c0_3, %c0_4] : memref<2x32xf32, #tpu.memory_space<vmem>>, vector<2x32xf32>
    %6 = arith.addf %5, %1 : vector<2x32xf32>
    %c0_5 = arith.constant 0 : index
    %c0_6 = arith.constant 0 : index
    %7 = vector.load %arg6[%c0_5, %c0_6] : memref<2x32xf32, #tpu.memory_space<vmem>>, vector<2x32xf32>
    tpu.vector_store %arg6[%c0_5, %c0_6], %6 {strides = array<i32>} : memref<2x32xf32, #tpu.memory_space<vmem>>, vector<2x32xf32>,
    %c0_i32_7 = arith.constant 0 : i32
    %8 = arith.cmpi eq, %arg1, %c0_i32_7 : i32
    %9 = arith.extui %8 : i1 to i32
    %c0_i32_8 = arith.constant 0 : i32
    %10 = arith.cmpi ne, %9, %c0_i32_8 : i32
    scf.if %10 {
      %c0_9 = arith.constant 0 : index
      %c0_10 = arith.constant 0 : index
      %11 = vector.load %arg6[%c0_9, %c0_10] : memref<2x32xf32, #tpu.memory_space<vmem>>, vector<2x32xf32>
      %cst_11 = arith.constant 1.250000e-01 : f32
      %12 = vector.broadcast %cst_11 : f32 to vector<2x32xf32>
      %13 = arith.mulf %11, %12 : vector<2x32xf32>
      %c0_12 = arith.constant 0 : index
      %c0_13 = arith.constant 0 : index
      %14 = vector.load %arg3[%c0_12, %c0_13] : memref<32x32xf32, #tpu.memory_space<vmem>>, vector<32x32xf32>
      %cst_14 = arith.constant dense<0.000000e+00> : vector<2x32xf32>
      %15 = tpu.matmul %13, %14, %cst_14 {dimension_numbers = #tpu.dot_dimension_numbers<[1], [0], [0], [1], [0, 0, 1, 1], [], []>} : vector<2x32xf32>, vector<32x32xf32>, vector<2x32xf32> -> vector<2x32xf32>
      %c0_15 = arith.constant 0 : index
      %c0_16 = arith.constant 0 : index
      %16 = vector.load %arg4[%c0_15, %c0_16] : memref<1x32xf32, #tpu.memory_space<vmem>>, vector<1x32xf32>
      %17 = vector.broadcast %16 : vector<1x32xf32> to vector<2x32xf32>
      %18 = arith.addf %15, %17 : vector<2x32xf32>
      %c0_17 = arith.constant 0 : index
      %c0_18 = arith.constant 0 : index
      %19 = vector.load %arg5[%c0_17, %c0_18] : memref<2x32xf32, #tpu.memory_space<vmem>>, vector<2x32xf32>
      tpu.vector_store %arg5[%c0_17, %c0_18], %18 {strides = array<i32>} : memref<2x32xf32, #tpu.memory_space<vmem>>, vector<2x32xf32>,
    } else {
    }
    return
  }
  func.func @transform_0(%arg0: i32, %arg1: i32) -> (i32, i32, i32) {
    %c0_i32 = arith.constant 0 : i32
    %c0_i32_0 = arith.constant 0 : i32
    return %arg0, %arg1, %c0_i32 : i32, i32, i32
  }
  func.func @transform_1(%arg0: i32, %arg1: i32) -> (i32, i32) {
    %c0_i32 = arith.constant 0 : i32
    %c0_i32_0 = arith.constant 0 : i32
    %c0_i32_1 = arith.constant 0 : i32
    return %c0_i32, %c0_i32_0 : i32, i32
  }
  func.func @transform_2(%arg0: i32, %arg1: i32) -> (i32, i32) {
    %c0_i32 = arith.constant 0 : i32
    %c0_i32_0 = arith.constant 0 : i32
    %c0_i32_1 = arith.constant 0 : i32
    return %c0_i32, %c0_i32_0 : i32, i32
  }
  func.func @transform_3(%arg0: i32, %arg1: i32) -> (i32, i32) {
    %c0_i32 = arith.constant 0 : i32
    %c0_i32_0 = arith.constant 0 : i32
    return %arg0, %c0_i32 : i32, i32
  }
}

module attributes {stable_mosaic.version = 11 : i64} {
  func.func @_encoder_output_state_kernel(%arg0: i32, %arg1: i32, %arg2: memref<2x8x32xf32, #tpu.memory_space<vmem>>, %arg3: memref<32x32xf32, #tpu.memory_space<vmem>>, %arg4: memref<1x32xf32, #tpu.memory_space<vmem>>, %arg5: memref<2x32xf32, #tpu.memory_space<vmem>>, %arg6: memref<2x32xf32, #tpu.memory_space<vmem>>) attributes {dimension_semantics = [#tpu.dimension_semantics<parallel>, #tpu.dimension_semantics<arbitrary>], iteration_bounds = array<i64: 1, 1>, scalar_prefetch = 0 : i64, scratch_operands = 1 : i64, tpu.core_type = #tpu.core_type<tc>, window_params = [{transform_indices = @transform_0, window_bounds = array<i64: 2, 8, 32>}, {pipeline_mode = #tpu.pipeline_mode<synchronous>, transform_indices = @transform_1, window_bounds = array<i64: 32, 32>}, {pipeline_mode = #tpu.pipeline_mode<synchronous>, transform_indices = @transform_2, window_bounds = array<i64: 1, 32>}, {transform_indices = @transform_3, window_bounds = array<i64: 2, 32>}]} {
    %c0 = arith.constant 0 : index
    %c0_0 = arith.constant 0 : index
    %c0_1 = arith.constant 0 : index
    %0 = vector.load %arg2[%c0, %c0_0, %c0_1] : memref<2x8x32xf32, #tpu.memory_space<vmem>>, vector<2x8x32xf32>
    %cst = arith.constant dense<0.000000e+00> : vector<2x32xf32>
    %1 = vector.multi_reduction <add>, %0, %cst [1] : vector<2x8x32xf32> to vector<2x32xf32>
    %c0_i32 = arith.constant 0 : i32
    %2 = arith.cmpi eq, %arg1, %c0_i32 : i32
    %3 = arith.extui %2 : i1 to i32
    %c0_i32_2 = arith.constant 0 : i32
    %4 = arith.cmpi ne, %3, %c0_i32_2 : i32
    scf.if %4 {
      %cst_9 = arith.constant 0.000000e+00 : f32
      %11 = vector.broadcast %cst_9 : f32 to vector<2x32xf32>
      %c0_10 = arith.constant 0 : index
      %c0_11 = arith.constant 0 : index
      %12 = vector.load %arg6[%c0_10, %c0_11] : memref<2x32xf32, #tpu.memory_space<vmem>>, vector<2x32xf32>
      tpu.vector_store %arg6[%c0_10, %c0_11], %11 {strides = array<i32>} : memref<2x32xf32, #tpu.memory_space<vmem>>, vector<2x32xf32>,
    } else {
    }
    %c0_3 = arith.constant 0 : index
    %c0_4 = arith.constant 0 : index
    %5 = vector.load %arg6[%c0_3, %c0_4] : memref<2x32xf32, #tpu.memory_space<vmem>>, vector<2x32xf32>
    %6 = arith.addf %5, %1 : vector<2x32xf32>
    %c0_5 = arith.constant 0 : index
    %c0_6 = arith.constant 0 : index
    %7 = vector.load %arg6[%c0_5, %c0_6] : memref<2x32xf32, #tpu.memory_space<vmem>>, vector<2x32xf32>
    tpu.vector_store %arg6[%c0_5, %c0_6], %6 {strides = array<i32>} : memref<2x32xf32, #tpu.memory_space<vmem>>, vector<2x32xf32>,
    %c0_i32_7 = arith.constant 0 : i32
    %8 = arith.cmpi eq, %arg1, %c0_i32_7 : i32
    %9 = arith.extui %8 : i1 to i32
    %c0_i32_8 = arith.constant 0 : i32
    %10 = arith.cmpi ne, %9, %c0_i32_8 : i32
    scf.if %10 {
      %c0_9 = arith.constant 0 : index
      %c0_10 = arith.constant 0 : index
      %11 = vector.load %arg6[%c0_9, %c0_10] : memref<2x32xf32, #tpu.memory_space<vmem>>, vector<2x32xf32>
      %cst_11 = arith.constant 1.250000e-01 : f32
      %12 = vector.broadcast %cst_11 : f32 to vector<2x32xf32>
      %13 = arith.mulf %11, %12 : vector<2x32xf32>
      %c0_12 = arith.constant 0 : index
      %c0_13 = arith.constant 0 : index
      %14 = vector.load %arg3[%c0_12, %c0_13] : memref<32x32xf32, #tpu.memory_space<vmem>>, vector<32x32xf32>
      %cst_14 = arith.constant dense<0.000000e+00> : vector<2x32xf32>
      %15 = tpu.matmul %13, %14, %cst_14 {dimension_numbers = #tpu.dot_dimension_numbers<[1], [0], [0], [1], [0, 0, 1, 1], [], []>} : vector<2x32xf32>, vector<32x32xf32>, vector<2x32xf32> -> vector<2x32xf32>
      %c0_15 = arith.constant 0 : index
      %c0_16 = arith.constant 0 : index
      %16 = vector.load %arg4[%c0_15, %c0_16] : memref<1x32xf32, #tpu.memory_space<vmem>>, vector<1x32xf32>
      %17 = vector.broadcast %16 : vector<1x32xf32> to vector<2x32xf32>
      %18 = arith.addf %15, %17 : vector<2x32xf32>
      %c0_17 = arith.constant 0 : index
      %c0_18 = arith.constant 0 : index
      %19 = vector.load %arg5[%c0_17, %c0_18] : memref<2x32xf32, #tpu.memory_space<vmem>>, vector<2x32xf32>
      tpu.vector_store %arg5[%c0_17, %c0_18], %18 {strides = array<i32>} : memref<2x32xf32, #tpu.memory_space<vmem>>, vector<2x32xf32>,
    } else {
    }
    return
  }
  func.func @transform_0(%arg0: i32, %arg1: i32) -> (i32, i32, i32) {
    %c0_i32 = arith.constant 0 : i32
    %c0_i32_0 = arith.constant 0 : i32
    return %arg0, %arg1, %c0_i32 : i32, i32, i32
  }
  func.func @transform_1(%arg0: i32, %arg1: i32) -> (i32, i32) {
    %c0_i32 = arith.constant 0 : i32
    %c0_i32_0 = arith.constant 0 : i32
    %c0_i32_1 = arith.constant 0 : i32
    return %c0_i32, %c0_i32_0 : i32, i32
  }
  func.func @transform_2(%arg0: i32, %arg1: i32) -> (i32, i32) {
    %c0_i32 = arith.constant 0 : i32
    %c0_i32_0 = arith.constant 0 : i32
    %c0_i32_1 = arith.constant 0 : i32
    return %c0_i32, %c0_i32_0 : i32, i32
  }
  func.func @transform_3(%arg0: i32, %arg1: i32) -> (i32, i32) {
    %c0_i32 = arith.constant 0 : i32
    %c0_i32_0 = arith.constant 0 : i32
    return %arg0, %c0_i32 : i32, i32
  }
}

</mosaic_0001>

<bundles_post_ra>
// kernel: tpu_custom_call.1
= control target key start
LH: loop header
LB: loop body
LE: loop exit
PB: predicated region body
PF: predicated region fallthrough
CT: control target
= control target key end

     0   :  { %8 = vsyncpa [#allocation4], 0  ;;  %s358_s0 = inlined_call_operand.hbm [shape: f32[2,8,32], index: 0, kind: input, shape index: {}]   ;;  %s359_s1 = inlined_call_operand.hbm [shape: f32[32,32], index: 1, kind: input, shape index: {}]   ;;  %s360_s2 = inlined_call_operand.vmem [shape: f32[1,32], index: 2, kind: input, shape index: {}]   ;;  %s361_s3 = inlined_call_operand.hbm [shape: f32[2,32], index: 3, kind: output, shape index: {}]  }
   0x1   :  { %9 = vsyncpa [#allocation7], 0 }
   0x2   :  { %10 = vsyncpa [#allocation5], 0  ;;  %s285_s12 = smov [#allocation3]   ;;  %s213_s16 = scalar_lea.hbm %s358_s0, 256 }
   0x3   :  { %s16_s13 = sshll.u32 %s285_s12, 4  ;;  %p214_p0 = scmp.ne.s32.totalorder %s358_s0, %s213_s16  ;;  %s17_s13 = int_to_ptr.vmem [resolvable:$true] %s16_s13 }
   0x4   :  { %p217_p1 = scmp.lt.u32.totalorder %s213_s16, %s358_s0 }
   0x6   :  { %p219_p2 = pnand %p217_p1, %p214_p0 }
   0x8   :  { %222 = shalt.err (!%p219_p2)
}
   0x9   :  { %s223_s21 = scalar_lea.vmem %s17_s13, 256  ;;  %p228_p4 = scmp.lt.s32.totalorder %s17_s13, %s17_s13 }
   0xa   :  { %p224_p3 = scmp.ne.s32.totalorder %s17_s13, %s223_s21  ;;  %p229_p5 = scmp.lt.s32.totalorder %s223_s21, %s223_s21 }
   0xc   :  { %p230_p6 = por %p229_p5, %p228_p4 }
   0xe   :  { %p231_p7 = pnand %p230_p6, %p224_p3 }
  0x10   :  { %234 = shalt.err (!%p231_p7)
}
  0x11   :  { %s286_s22 = smov 128   ;;  %s287_s23 = smov 8  }
  0x12   :  { %22 = dma.hbm_to_vmem [thread:$0]  %s358_s0, 256, %s17_s13, [#allocation4], %s286_s22, %s286_s22, %s287_s23  }
  0x13   :  { %s288_s26 = smov [#allocation6]   ;;  %s235_s30 = scalar_lea.hbm %s359_s1, 512 }
  0x14   :  { %s28_s27 = sshll.u32 %s288_s26, 4  ;;  %p236_p8 = scmp.ne.s32.totalorder %s359_s1, %s235_s30  ;;  %s29_s27 = int_to_ptr.vmem [resolvable:$true] %s28_s27 }
  0x15   :  { %p239_p9 = scmp.lt.u32.totalorder %s235_s30, %s359_s1 }
  0x17   :  { %p241_p10 = pnand %p239_p9, %p236_p8 }
  0x19   :  { %244 = shalt.err (!%p241_p10)
}
  0x1a   :  { %s245_s8 = scalar_lea.vmem %s29_s27, 512  ;;  %p250_p12 = scmp.lt.s32.totalorder %s29_s27, %s29_s27 }
  0x1b   :  { %p246_p11 = scmp.ne.s32.totalorder %s29_s27, %s245_s8  ;;  %p251_p13 = scmp.lt.s32.totalorder %s245_s8, %s245_s8 }
  0x1d   :  { %p252_p0 = por %p251_p13, %p250_p12 }
  0x1f   :  { %p253_p1 = pnand %p252_p0, %p246_p11 }
  0x21   :  { %256 = shalt.err (!%p253_p1)
}
  0x22   :  { %34 = dma.hbm_to_vmem [thread:$0]  %s359_s1, 512, %s29_s27, [#allocation7], %s286_s22, %s286_s22, %s287_s23  }
  0x23   :  { %279 = dma.done.wait [#allocation4], 256  }
  0x24   :  { %280 = vsyncadd [#allocation4], 4294967040 }
  0x25   :  { %281 = dma.done.wait [#allocation7], 512  }
  0x26   :  { %282 = vsyncadd [#allocation7], 4294966784  ;;  %vm64_vm0 = vcmask 254976   ;;  %v289_v0 = vmov 0.0|0.0   ;;  %v290_v1 = vmov 0.0   ;;  %vm291_vm1 = vmmov 0  }
  0x27   :  { %199 = vmatprep.subr.bf16.mxu0 %v289_v0  ;;  %65 = vst.msk [vmem:[#allocation2] sm:$0x3] %vm64_vm0, %v290_v1  ;;  %196 = vmatprep.mubr.msk.f32.mxu0 %vm291_vm1, %v290_v1  ;;  %vm45_vm2 = vcmask 261120   ;;  %v80_v2 = vld [vmem:[#allocation6] sm:$0xff]  ;;  %v81_v3 = vld [vmem:[#allocation6 + $0x8] sm:$0xff]  ;;  %v82_v4 = vld [vmem:[#allocation6 + $0x10] sm:$0xff] }
  0x28   :  { %v200_v5 = vpack.c.bf16 %v81_v3, %v80_v2  ;;  %v83_v6 = vld [vmem:[#allocation6 + $0x18] sm:$0xff]  ;;  %v43_v7 = vld [vmem:[#allocation3] sm:$0xff]  ;;  %vm69_vm3 = vcmask 1041409   ;;  %v181_v29 = vld [vmem:[%s360_s2] ss:$0 sm:$0xff]  ;;  %s292_s11 = smov [#allocation8]  }
  0x29   :  { %v44_v8 = vld [vmem:[#allocation3 + $0x8] sm:$0xff]  ;;  %v46_v9 = vsel %vm45_vm2, %v43_v7, 0.0  ;;  %v203_v11 = vpack.c.bf16 %v83_v6, %v82_v4  ;;  %s171_s12 = sshll.u32 %s292_s11, 4  ;;  %s172_s12 = int_to_ptr.vmem [resolvable:$true] %s171_s12 }
  0x2a   :  { %v53_v10 = vsel %vm45_vm2, %v44_v8, 0.0  ;;  %201 = vmatpush3.bf16.msra.mxu0 %v200_v5  ;;  %v47_v12 = vrot.slane %v46_v9, 4  ;;  %s257_s13 = scalar_lea.vmem %s172_s12, 32  ;;  %p262_p3 = scmp.lt.s32.totalorder %s172_s12, %s172_s12 }
  0x2b   :  { %v54_v13 = vrot.slane %v53_v10, 4  ;;  %202 = vmatprep.subr.bf16.mxu0 %v289_v0  ;;  %p258_p2 = scmp.ne.s32.totalorder %s172_s12, %s257_s13  ;;  %p263_p4 = scmp.lt.s32.totalorder %s257_s13, %s257_s13 }
  0x2c   :  { %v48_v14 = vadd.f32 %v47_v12, %v46_v9 }
  0x2d   :  { %v55_v15 = vadd.f32 %v54_v13, %v53_v10  ;;  %p264_p5 = por %p263_p4, %p262_p3 }
  0x2e   :  { %204 = vmatpush3.bf16.msra.mxu0 %v203_v11  ;;  %v49_v16 = vrot.slane %v48_v14, 2  ;;  %v66_v24 = vld [vmem:[#allocation2] sm:$0x3] }
  0x2f   :  { %v56_v17 = vrot.slane %v55_v15, 2  ;;  %p265_p6 = pnand %p264_p5, %p258_p2 }
  0x30   :  { %v50_v18 = vadd.f32 %v49_v16, %v48_v14 }
  0x31   :  { %v57_v19 = vadd.f32 %v56_v17, %v55_v15 }
  0x32   :  { %v51_v20 = vrot.slane %v50_v18, 1 }
  0x33   :  { %v58_v21 = vrot.slane %v57_v19, 1 }
  0x34   :  { %v52_v22 = vadd.f32 %v51_v20, %v50_v18 }
  0x35   :  { %v59_v23 = vadd.f32 %v58_v21, %v57_v19 }
  0x37   :  { %v70_v25 = vsel %vm69_vm3, %v59_v23, %v52_v22 }
  0x38   :  { %v72_v26 = vadd.f32 %v70_v25, %v66_v24 }
  0x3a   :  { %74 = vst.msk [vmem:[#allocation2] sm:$0x3] %vm64_vm0, %v72_v26 }
  0x41   :  { %v78_v27 = vld [vmem:[#allocation2] sm:$0x3] }
  0x42   :  { %v79_v28 = vmul.f32 0.125, %v78_v27 }
  0x44   :  { %197 = vmatmul.mubr.msk.f32.vlgmr.msra.gmra.mrb[0].mxu0 %vm45_vm2, %v79_v28 }
 0x117   :  { %v160_v30 = vpop.f32.mrb[0].mxu0 }
 0x118   :  { %v161_v31 = vadd.f32 %v181_v29, %v160_v30  ;;  %v198_v32 = vpop.f32.mrb[1].mxu0 }
 0x11a   :  { %164 = vst.msk [vmem:[#allocation8] sm:$0x3] %vm64_vm0, %v161_v31 }
 0x11b   :  { %268 = shalt.err (!%p265_p6)
}
 0x11c   :  { %s269_s16 = scalar_lea.hbm %s361_s3, 32 }
 0x11d   :  { %p270_p7 = scmp.ne.s32.totalorder %s361_s3, %s269_s16  ;;  %p273_p8 = scmp.lt.u32.totalorder %s269_s16, %s361_s3 }
 0x11f   :  { %p275_p9 = pnand %p273_p8, %p270_p7 }
 0x121   :  { %278 = shalt.err (!%p275_p9)
}
 0x122   :  { %174 = dma.vmem_to_hbm [thread:$0]  %s172_s12, 32, %s361_s3, [#allocation5]  }
 0x123   :  { %283 = dma.done.wait [#allocation5], 32  }
 0x124   :  { %284 = vsyncadd [#allocation5], 4294967264 }
 0x125   :  { %178 = vsyncpa [#allocation4], 1 }
 0x126   :  { %179 = vsyncpa [#allocation7], 1 }
 0x127   :  { %180 = vsyncpa [#allocation5], 1 }

// kernel: tpu_custom_call.1
= control target key start
LH: loop header
LB: loop body
LE: loop exit
PB: predicated region body
PF: predicated region fallthrough
CT: control target
= control target key end

     0   :  { %8 = vsyncpa [#allocation4], 0  ;;  %s358_s0 = inlined_call_operand.hbm [shape: f32[2,8,32], index: 0, kind: input, shape index: {}]   ;;  %s359_s1 = inlined_call_operand.hbm [shape: f32[32,32], index: 1, kind: input, shape index: {}]   ;;  %s360_s2 = inlined_call_operand.vmem [shape: f32[1,32], index: 2, kind: input, shape index: {}]   ;;  %s361_s3 = inlined_call_operand.hbm [shape: f32[2,32], index: 3, kind: output, shape index: {}]  }
   0x1   :  { %9 = vsyncpa [#allocation7], 0 }
   0x2   :  { %10 = vsyncpa [#allocation5], 0  ;;  %s285_s12 = smov [#allocation3]   ;;  %s213_s16 = scalar_lea.hbm %s358_s0, 256 }
   0x3   :  { %s16_s13 = sshll.u32 %s285_s12, 4  ;;  %p214_p0 = scmp.ne.s32.totalorder %s358_s0, %s213_s16  ;;  %s17_s13 = int_to_ptr.vmem [resolvable:$true] %s16_s13 }
   0x4   :  { %p217_p1 = scmp.lt.u32.totalorder %s213_s16, %s358_s0 }
   0x6   :  { %p219_p2 = pnand %p217_p1, %p214_p0 }
   0x8   :  { %222 = shalt.err (!%p219_p2)
}
   0x9   :  { %s223_s21 = scalar_lea.vmem %s17_s13, 256  ;;  %p228_p4 = scmp.lt.s32.totalorder %s17_s13, %s17_s13 }
   0xa   :  { %p224_p3 = scmp.ne.s32.totalorder %s17_s13, %s223_s21  ;;  %p229_p5 = scmp.lt.s32.totalorder %s223_s21, %s223_s21 }
   0xc   :  { %p230_p6 = por %p229_p5, %p228_p4 }
   0xe   :  { %p231_p7 = pnand %p230_p6, %p224_p3 }
  0x10   :  { %234 = shalt.err (!%p231_p7)
}
  0x11   :  { %s286_s22 = smov 128   ;;  %s287_s23 = smov 8  }
  0x12   :  { %22 = dma.hbm_to_vmem [thread:$0]  %s358_s0, 256, %s17_s13, [#allocation4], %s286_s22, %s286_s22, %s287_s23  }
  0x13   :  { %s288_s26 = smov [#allocation6]   ;;  %s235_s30 = scalar_lea.hbm %s359_s1, 512 }
  0x14   :  { %s28_s27 = sshll.u32 %s288_s26, 4  ;;  %p236_p8 = scmp.ne.s32.totalorder %s359_s1, %s235_s30  ;;  %s29_s27 = int_to_ptr.vmem [resolvable:$true] %s28_s27 }
  0x15   :  { %p239_p9 = scmp.lt.u32.totalorder %s235_s30, %s359_s1 }
  0x17   :  { %p241_p10 = pnand %p239_p9, %p236_p8 }
  0x19   :  { %244 = shalt.err (!%p241_p10)
}
  0x1a   :  { %s245_s8 = scalar_lea.vmem %s29_s27, 512  ;;  %p250_p12 = scmp.lt.s32.totalorder %s29_s27, %s29_s27 }
  0x1b   :  { %p246_p11 = scmp.ne.s32.totalorder %s29_s27, %s245_s8  ;;  %p251_p13 = scmp.lt.s32.totalorder %s245_s8, %s245_s8 }
  0x1d   :  { %p252_p0 = por %p251_p13, %p250_p12 }
  0x1f   :  { %p253_p1 = pnand %p252_p0, %p246_p11 }
  0x21   :  { %256 = shalt.err (!%p253_p1)
}
  0x22   :  { %34 = dma.hbm_to_vmem [thread:$0]  %s359_s1, 512, %s29_s27, [#allocation7], %s286_s22, %s286_s22, %s287_s23  }
  0x23   :  { %279 = dma.done.wait [#allocation4], 256  }
  0x24   :  { %280 = vsyncadd [#allocation4], 4294967040 }
  0x25   :  { %281 = dma.done.wait [#allocation7], 512  }
  0x26   :  { %282 = vsyncadd [#allocation7], 4294966784  ;;  %vm64_vm0 = vcmask 254976   ;;  %v289_v0 = vmov 0.0|0.0   ;;  %v290_v1 = vmov 0.0   ;;  %vm291_vm1 = vmmov 0  }
  0x27   :  { %199 = vmatprep.subr.bf16.mxu0 %v289_v0  ;;  %65 = vst.msk [vmem:[#allocation2] sm:$0x3] %vm64_vm0, %v290_v1  ;;  %196 = vmatprep.mubr.msk.f32.mxu0 %vm291_vm1, %v290_v1  ;;  %vm45_vm2 = vcmask 261120   ;;  %v80_v2 = vld [vmem:[#allocation6] sm:$0xff]  ;;  %v81_v3 = vld [vmem:[#allocation6 + $0x8] sm:$0xff]  ;;  %v82_v4 = vld [vmem:[#allocation6 + $0x10] sm:$0xff] }
  0x28   :  { %v200_v5 = vpack.c.bf16 %v81_v3, %v80_v2  ;;  %v83_v6 = vld [vmem:[#allocation6 + $0x18] sm:$0xff]  ;;  %v43_v7 = vld [vmem:[#allocation3] sm:$0xff]  ;;  %vm69_vm3 = vcmask 1041409   ;;  %v181_v29 = vld [vmem:[%s360_s2] ss:$0 sm:$0xff]  ;;  %s292_s11 = smov [#allocation8]  }
  0x29   :  { %v44_v8 = vld [vmem:[#allocation3 + $0x8] sm:$0xff]  ;;  %v46_v9 = vsel %vm45_vm2, %v43_v7, 0.0  ;;  %v203_v11 = vpack.c.bf16 %v83_v6, %v82_v4  ;;  %s171_s12 = sshll.u32 %s292_s11, 4  ;;  %s172_s12 = int_to_ptr.vmem [resolvable:$true] %s171_s12 }
  0x2a   :  { %v53_v10 = vsel %vm45_vm2, %v44_v8, 0.0  ;;  %201 = vmatpush3.bf16.msra.mxu0 %v200_v5  ;;  %v47_v12 = vrot.slane %v46_v9, 4  ;;  %s257_s13 = scalar_lea.vmem %s172_s12, 32  ;;  %p262_p3 = scmp.lt.s32.totalorder %s172_s12, %s172_s12 }
  0x2b   :  { %v54_v13 = vrot.slane %v53_v10, 4  ;;  %202 = vmatprep.subr.bf16.mxu0 %v289_v0  ;;  %p258_p2 = scmp.ne.s32.totalorder %s172_s12, %s257_s13  ;;  %p263_p4 = scmp.lt.s32.totalorder %s257_s13, %s257_s13 }
  0x2c   :  { %v48_v14 = vadd.f32 %v47_v12, %v46_v9 }
  0x2d   :  { %v55_v15 = vadd.f32 %v54_v13, %v53_v10  ;;  %p264_p5 = por %p263_p4, %p262_p3 }
  0x2e   :  { %204 = vmatpush3.bf16.msra.mxu0 %v203_v11  ;;  %v49_v16 = vrot.slane %v48_v14, 2  ;;  %v66_v24 = vld [vmem:[#allocation2] sm:$0x3] }
  0x2f   :  { %v56_v17 = vrot.slane %v55_v15, 2  ;;  %p265_p6 = pnand %p264_p5, %p258_p2 }
  0x30   :  { %v50_v18 = vadd.f32 %v49_v16, %v48_v14 }
  0x31   :  { %v57_v19 = vadd.f32 %v56_v17, %v55_v15 }
  0x32   :  { %v51_v20 = vrot.slane %v50_v18, 1 }
  0x33   :  { %v58_v21 = vrot.slane %v57_v19, 1 }
  0x34   :  { %v52_v22 = vadd.f32 %v51_v20, %v50_v18 }
  0x35   :  { %v59_v23 = vadd.f32 %v58_v21, %v57_v19 }
  0x37   :  { %v70_v25 = vsel %vm69_vm3, %v59_v23, %v52_v22 }
  0x38   :  { %v72_v26 = vadd.f32 %v70_v25, %v66_v24 }
  0x3a   :  { %74 = vst.msk [vmem:[#allocation2] sm:$0x3] %vm64_vm0, %v72_v26 }
  0x41   :  { %v78_v27 = vld [vmem:[#allocation2] sm:$0x3] }
  0x42   :  { %v79_v28 = vmul.f32 0.125, %v78_v27 }
  0x44   :  { %197 = vmatmul.mubr.msk.f32.vlgmr.msra.gmra.mrb[0].mxu0 %vm45_vm2, %v79_v28 }
 0x117   :  { %v160_v30 = vpop.f32.mrb[0].mxu0 }
 0x118   :  { %v161_v31 = vadd.f32 %v181_v29, %v160_v30  ;;  %v198_v32 = vpop.f32.mrb[1].mxu0 }
 0x11a   :  { %164 = vst.msk [vmem:[#allocation8] sm:$0x3] %vm64_vm0, %v161_v31 }
 0x11b   :  { %268 = shalt.err (!%p265_p6)
}
 0x11c   :  { %s269_s16 = scalar_lea.hbm %s361_s3, 32 }
 0x11d   :  { %p270_p7 = scmp.ne.s32.totalorder %s361_s3, %s269_s16  ;;  %p273_p8 = scmp.lt.u32.totalorder %s269_s16, %s361_s3 }
 0x11f   :  { %p275_p9 = pnand %p273_p8, %p270_p7 }
 0x121   :  { %278 = shalt.err (!%p275_p9)
}
 0x122   :  { %174 = dma.vmem_to_hbm [thread:$0]  %s172_s12, 32, %s361_s3, [#allocation5]  }
 0x123   :  { %283 = dma.done.wait [#allocation5], 32  }
 0x124   :  { %284 = vsyncadd [#allocation5], 4294967264 }
 0x125   :  { %178 = vsyncpa [#allocation4], 1 }
 0x126   :  { %179 = vsyncpa [#allocation7], 1 }
 0x127   :  { %180 = vsyncpa [#allocation5], 1 }

</bundles_post_ra>
